<compile_context>
chip_gen: v5e
topology: v5e:2x2
jax: 0.10.0
libtpu: 0.0.40
codegen_flags: <defaults>
</compile_context>

<pallas_src>
import jax
import jax.numpy as jnp
from jax.experimental import pallas as pl
from jax.experimental.pallas import tpu as pltpu


def _round_up(x, m):
    return (x + m - 1) // m * m


def _crossover_kernel(x_ref, wlin_ref, cstack_ref, b_ref, o_ref):
    """One M-tile: o = x @ (W_lin_t + sum_i C_t[i]) + b.

    x:(tm,K)  wlin:(K,N)  cstack:(num_crosstalk,K,N)  b:(1,N)  o:(tm,N)
    """
    # Fold base + crosstalk weights on-chip (VPU adds, tiny vs. the matmul), then one
    # MXU matmul with f32 accumulation.
    w_eff = wlin_ref[...] + jnp.sum(cstack_ref[...], axis=0)
    acc = jnp.dot(x_ref[...], w_eff, preferred_element_type=jnp.float32)
    o_ref[...] = (acc + b_ref[...]).astype(o_ref.dtype)


def crossover_forward(x, linear_w, linear_b, crosstalk_w, *, tm_max=512):
    """CrossoverLayer forward.

    x:           (M, D)                float32
    linear_w:    (D_out, D_in)         PyTorch nn.Linear layout
    linear_b:    (D_out,)
    crosstalk_w: (num_crosstalk, D_in, D_out)
    Requires D_in == D_out (as the literal PyTorch forward does).
    """
    M, K = x.shape
    d_out, d_in = linear_w.shape
    assert K == d_in, "feature mismatch"
    assert d_in == d_out, "CrossoverLayer forward requires in_features == out_features"
    num_crosstalk = crosstalk_w.shape[0]
    assert crosstalk_w.shape == (num_crosstalk, d_in, d_out)
    N = d_out

    # One-time weight layout plumbing: kernel consumes (K, N) operands for x @ W.
    w_lin_t = jnp.transpose(linear_w)                 # (K, N)   == W_lin.T
    c_t = jnp.transpose(crosstalk_w, (0, 2, 1))       # (C, K, N) == C_i.T stacked
    b2 = linear_b.reshape(1, N).astype(x.dtype)

    # Row tiling: big tiles (<= 512) to amortize per-grid-step overhead; no M padding.
    tm = min(tm_max, max(8, _round_up(M, 8)))
    grid_m = pl.cdiv(M, tm)

    # NOTE: for very large num_crosstalk * D^2 the crosstalk stack should be streamed
    # over a second ("arbitrary") grid axis with an f32 accumulator; unnecessary here.
    return pl.pallas_call(
        _crossover_kernel,
        out_shape=jax.ShapeDtypeStruct((M, N), x.dtype),
        grid=(grid_m,),
        in_specs=[
            pl.BlockSpec((tm, K), lambda i: (i, 0)),                 # row tile of x
            pl.BlockSpec((K, N), lambda i: (0, 0)),                  # base weight, resident
            pl.BlockSpec((num_crosstalk, K, N), lambda i: (0, 0, 0)),  # crosstalk stack, resident
            pl.BlockSpec((1, N), lambda i: (0, 0)),                  # bias row, resident
        ],
        out_specs=pl.BlockSpec((tm, N), lambda i: (i, 0)),
        compiler_params=pltpu.CompilerParams(
            dimension_semantics=("parallel",),
            vmem_limit_bytes=32 * 1024 * 1024,
        ),
    )(x, w_lin_t, c_t, b2)


if __name__ == "__main__":
    # Small shapes consistent with the module: in_features == out_features (required by
    # the literal forward), feature dim a multiple of 128 for lane-dense stores.
    B, D, NUM_CROSSTALK = 16, 256, 3

    root = jax.random.PRNGKey(0)
    kx, kw, kb, kc = jax.random.split(root, 4)
    x = jax.random.normal(kx, (B, D), jnp.float32)
    linear_w = jax.random.normal(kw, (D, D), jnp.float32) / jnp.sqrt(D)          # (out, in)
    linear_b = jax.random.normal(kb, (D,), jnp.float32)
    crosstalk_w = jax.random.normal(kc, (NUM_CROSSTALK, D, D), jnp.float32) / jnp.sqrt(D)

    fwd = jax.jit(crossover_forward)
    out = fwd(x, linear_w, linear_b, crosstalk_w)
    jax.block_until_ready(out)

    # Pure-JAX reference mirroring the PyTorch loop exactly.
    ref = jnp.dot(x, linear_w.T, precision="highest") + linear_b
    for i in range(NUM_CROSSTALK):
        ref = ref + jnp.dot(x, crosstalk_w[i].T, precision="highest")

    assert out.shape == (B, D), out.shape
    assert bool(jnp.all(jnp.isfinite(out)))
    max_err = float(jnp.max(jnp.abs(out - ref)))
    assert bool(jnp.allclose(out, ref, rtol=1e-2, atol=1e-2)), max_err
    print("KERNEL_OK")
</pallas_src>

<mosaic_0001>
module attributes {stable_mosaic.version = 11 : i64} {
  func.func @_crossover_kernel(%arg0: i32, %arg1: memref<16x256xf32, #tpu.memory_space<vmem>>, %arg2: memref<256x256xf32, #tpu.memory_space<vmem>>, %arg3: memref<3x256x256xf32, #tpu.memory_space<vmem>>, %arg4: memref<1x256xf32, #tpu.memory_space<vmem>>, %arg5: memref<16x256xf32, #tpu.memory_space<vmem>>) attributes {dimension_semantics = [#tpu.dimension_semantics<parallel>], iteration_bounds = array<i64: 1>, scalar_prefetch = 0 : i64, scratch_operands = 0 : i64, tpu.core_type = #tpu.core_type<tc>, window_params = [{transform_indices = @transform_0, window_bounds = array<i64: 16, 256>}, {pipeline_mode = #tpu.pipeline_mode<synchronous>, transform_indices = @transform_1, window_bounds = array<i64: 256, 256>}, {pipeline_mode = #tpu.pipeline_mode<synchronous>, transform_indices = @transform_2, window_bounds = array<i64: 3, 256, 256>}, {pipeline_mode = #tpu.pipeline_mode<synchronous>, transform_indices = @transform_3, window_bounds = array<i64: 1, 256>}, {transform_indices = @transform_4, window_bounds = array<i64: 16, 256>}]} {
    %c0 = arith.constant 0 : index
    %c0_0 = arith.constant 0 : index
    %0 = vector.load %arg2[%c0, %c0_0] : memref<256x256xf32, #tpu.memory_space<vmem>>, vector<256x256xf32>
    %c0_1 = arith.constant 0 : index
    %c0_2 = arith.constant 0 : index
    %c0_3 = arith.constant 0 : index
    %1 = vector.load %arg3[%c0_1, %c0_2, %c0_3] : memref<3x256x256xf32, #tpu.memory_space<vmem>>, vector<3x256x256xf32>
    %cst = arith.constant dense<0.000000e+00> : vector<256x256xf32>
    %2 = vector.multi_reduction <add>, %1, %cst [0] : vector<3x256x256xf32> to vector<256x256xf32>
    %3 = arith.addf %0, %2 : vector<256x256xf32>
    %c0_4 = arith.constant 0 : index
    %c0_5 = arith.constant 0 : index
    %4 = vector.load %arg1[%c0_4, %c0_5] : memref<16x256xf32, #tpu.memory_space<vmem>>, vector<16x256xf32>
    %cst_6 = arith.constant dense<0.000000e+00> : vector<16x256xf32>
    %5 = tpu.matmul %4, %3, %cst_6 {dimension_numbers = #tpu.dot_dimension_numbers<[1], [0], [0], [1], [0, 0, 1, 1], [], []>} : vector<16x256xf32>, vector<256x256xf32>, vector<16x256xf32> -> vector<16x256xf32>
    %c0_7 = arith.constant 0 : index
    %c0_8 = arith.constant 0 : index
    %6 = vector.load %arg4[%c0_7, %c0_8] : memref<1x256xf32, #tpu.memory_space<vmem>>, vector<1x256xf32>
    %7 = vector.broadcast %6 : vector<1x256xf32> to vector<16x256xf32>
    %8 = arith.addf %5, %7 : vector<16x256xf32>
    %c0_9 = arith.constant 0 : index
    %c0_10 = arith.constant 0 : index
    %9 = vector.load %arg5[%c0_9, %c0_10] : memref<16x256xf32, #tpu.memory_space<vmem>>, vector<16x256xf32>
    tpu.vector_store %arg5[%c0_9, %c0_10], %8 {strides = array<i32>} : memref<16x256xf32, #tpu.memory_space<vmem>>, vector<16x256xf32>,
    return
  }
  func.func @transform_0(%arg0: i32) -> (i32, i32) {
    %c0_i32 = arith.constant 0 : i32
    %c0_i32_0 = arith.constant 0 : i32
    return %arg0, %c0_i32 : i32, i32
  }
  func.func @transform_1(%arg0: i32) -> (i32, i32) {
    %c0_i32 = arith.constant 0 : i32
    %c0_i32_0 = arith.constant 0 : i32
    %c0_i32_1 = arith.constant 0 : i32
    return %c0_i32, %c0_i32_0 : i32, i32
  }
  func.func @transform_2(%arg0: i32) -> (i32, i32, i32) {
    %c0_i32 = arith.constant 0 : i32
    %c0_i32_0 = arith.constant 0 : i32
    %c0_i32_1 = arith.constant 0 : i32
    %c0_i32_2 = arith.constant 0 : i32
    return %c0_i32, %c0_i32_0, %c0_i32_1 : i32, i32, i32
  }
  func.func @transform_3(%arg0: i32) -> (i32, i32) {
    %c0_i32 = arith.constant 0 : i32
    %c0_i32_0 = arith.constant 0 : i32
    %c0_i32_1 = arith.constant 0 : i32
    return %c0_i32, %c0_i32_0 : i32, i32
  }
  func.func @transform_4(%arg0: i32) -> (i32, i32) {
    %c0_i32 = arith.constant 0 : i32
    %c0_i32_0 = arith.constant 0 : i32
    return %arg0, %c0_i32 : i32, i32
  }
}

</mosaic_0001>

<bundles_post_ra>
// kernel: crossover_forward.1
= control target key start
LH: loop header
LB: loop body
LE: loop exit
PB: predicated region body
PF: predicated region fallthrough
CT: control target
= control target key end

     0   :  { %s1437_s0 = inlined_call_operand.vmem [shape: f32[16,256], index: 0, kind: input, shape index: {}]   ;;  %s1438_s1 = inlined_call_operand.vmem [shape: f32[256,256], index: 1, kind: input, shape index: {}]   ;;  %s1439_s2 = inlined_call_operand.vmem [shape: f32[3,256,256], index: 2, kind: input, shape index: {}]   ;;  %s1440_s3 = inlined_call_operand.vmem [shape: f32[1,256], index: 3, kind: input, shape index: {}]   ;;  %s1441_s4 = inlined_call_operand.hbm [shape: f32[16,256], index: 4, kind: output, shape index: {}]  }
   0x1   :  { %v113_v0 = vld [vmem:[%s1439_s2 + $0xf8] sm:$0xff]  ;;  %v111_v4 = vld [vmem:[%s1439_s2 + $0xe8] sm:$0xff]  ;;  %v112_v30 = vld [vmem:[%s1439_s2 + $0xf0] sm:$0xff] }
   0x2   :  { %v177_v1 = vld [vmem:[%s1439_s2 + $0x2f8] sm:$0xff]  ;;  %v175_v6 = vld [vmem:[%s1439_s2 + $0x2e8] sm:$0xff]  ;;  %v176_v31 = vld [vmem:[%s1439_s2 + $0x2f0] sm:$0xff] }
   0x3   :  { %v241_v2 = vld [vmem:[%s1439_s2 + $0x4f8] sm:$0xff]  ;;  %v336_v3 = vadd.f32 %v177_v1, %v113_v0  ;;  %v239_v7 = vld [vmem:[%s1439_s2 + $0x4e8] sm:$0xff]  ;;  %v332_v9 = vadd.f32 %v175_v6, %v111_v4  ;;  %v240_v32 = vld [vmem:[%s1439_s2 + $0x4f0] sm:$0xff]  ;;  %v334_v35 = vadd.f32 %v176_v31, %v112_v30 }
   0x4   :  { %v49_v5 = vld [vmem:[%s1438_s1 + $0xf8] sm:$0xff]  ;;  %v47_v13 = vld [vmem:[%s1438_s1 + $0xe8] sm:$0xff]  ;;  %v48_v40 = vld [vmem:[%s1438_s1 + $0xf0] sm:$0xff] }
   0x5   :  { %v337_v8 = vadd.f32 %v336_v3, %v241_v2  ;;  %v145_v10 = vld [vmem:[%s1439_s2 + $0x1f8] sm:$0xff]  ;;  %v333_v18 = vadd.f32 %v332_v9, %v239_v7  ;;  %v143_v22 = vld [vmem:[%s1439_s2 + $0x1e8] sm:$0xff]  ;;  %v335_v44 = vadd.f32 %v334_v35, %v240_v32  ;;  %v110_v51 = vld [vmem:[%s1439_s2 + $0xe0] sm:$0xff] }
   0x6   :  { %v209_v11 = vld [vmem:[%s1439_s2 + $0x3f8] sm:$0xff]  ;;  %v207_v25 = vld [vmem:[%s1439_s2 + $0x3e8] sm:$0xff]  ;;  %v174_v52 = vld [vmem:[%s1439_s2 + $0x2e0] sm:$0xff] }
   0x7   :  { %v273_v12 = vld [vmem:[%s1439_s2 + $0x5f8] sm:$0xff]  ;;  %v400_v14 = vadd.f32 %v209_v11, %v145_v10  ;;  %v433_v17 = vadd.f32 %v337_v8, %v49_v5  ;;  %v271_v26 = vld [vmem:[%s1439_s2 + $0x5e8] sm:$0xff]  ;;  %v431_v27 = vadd.f32 %v333_v18, %v47_v13  ;;  %v396_v29 = vadd.f32 %v207_v25, %v143_v22  ;;  %v238_v53 = vld [vmem:[%s1439_s2 + $0x4e0] sm:$0xff] }
   0x8   :  { %v109_v15 = vld [vmem:[%s1439_s2 + $0xd8] sm:$0xff]  ;;  %v79_v34 = vld [vmem:[%s1438_s1 + $0x1e8] sm:$0xff]  ;;  %v432_v54 = vadd.f32 %v335_v44, %v48_v40  ;;  %v330_v56 = vadd.f32 %v174_v52, %v110_v51  ;;  %v144_v57 = vld [vmem:[%s1439_s2 + $0x1f0] sm:$0xff] }
   0x9   :  { %v173_v16 = vld [vmem:[%s1439_s2 + $0x2d8] sm:$0xff]  ;;  %v401_v23 = vadd.f32 %v400_v14, %v273_v12  ;;  %522 = vmatpush.msra.mxu2 %v433_v17  ;;  %v107_v36 = vld [vmem:[%s1439_s2 + $0xc8] sm:$0xff]  ;;  %v397_v39 = vadd.f32 %v396_v29, %v271_v26  ;;  %v208_v58 = vld [vmem:[%s1439_s2 + $0x3f0] sm:$0xff] }
   0xa   :  { %v81_v19 = vld [vmem:[%s1438_s1 + $0x1f8] sm:$0xff]  ;;  %v328_v21 = vadd.f32 %v173_v16, %v109_v15  ;;  %v171_v37 = vld [vmem:[%s1439_s2 + $0x2c8] sm:$0xff]  ;;  %v46_v61 = vld [vmem:[%s1438_s1 + $0xe0] sm:$0xff]  ;;  %v398_v63 = vadd.f32 %v208_v58, %v144_v57  ;;  %476 = vmatpush.msra.mxu0 %v432_v54  ;;  %v331_v1 = vadd.f32 %v330_v56, %v238_v53 }
   0xb   :  { %v237_v20 = vld [vmem:[%s1439_s2 + $0x4d8] sm:$0xff]  ;;  %v465_v33 = vadd.f32 %v401_v23, %v81_v19  ;;  %523 = vmatpush.msra.mxu2 %v431_v27  ;;  %v235_v41 = vld [vmem:[%s1439_s2 + $0x4c8] sm:$0xff]  ;;  %v324_v42 = vadd.f32 %v171_v37, %v107_v36  ;;  %v463_v48 = vadd.f32 %v397_v39, %v79_v34  ;;  %v272_v62 = vld [vmem:[%s1439_s2 + $0x5f0] sm:$0xff] }
   0xc   :  { %v45_v24 = vld [vmem:[%s1438_s1 + $0xd8] sm:$0xff]  ;;  %v329_v28 = vadd.f32 %v328_v21, %v237_v20  ;;  %v43_v45 = vld [vmem:[%s1438_s1 + $0xc8] sm:$0xff]  ;;  %v80_v2 = vld [vmem:[%s1438_s1 + $0x1f0] sm:$0xff]  ;;  %v399_v6 = vadd.f32 %v398_v63, %v272_v62  ;;  %v430_v11 = vadd.f32 %v331_v1, %v46_v61 }
   0xd   :  { %v141_v43 = vld [vmem:[%s1439_s2 + $0x1d8] sm:$0xff]  ;;  %545 = vmatpush.msra.mxu3 %v465_v33  ;;  %v325_v49 = vadd.f32 %v324_v42, %v235_v41  ;;  %v139_v8 = vld [vmem:[%s1439_s2 + $0x1c8] sm:$0xff]  ;;  %v108_v14 = vld [vmem:[%s1439_s2 + $0xd0] sm:$0xff] }
   0xe   :  { %v429_v38 = vadd.f32 %v329_v28, %v45_v24  ;;  %v205_v46 = vld [vmem:[%s1439_s2 + $0x3d8] sm:$0xff]  ;;  %v203_v9 = vld [vmem:[%s1439_s2 + $0x3c8] sm:$0xff]  ;;  %v172_v15 = vld [vmem:[%s1439_s2 + $0x2d0] sm:$0xff]  ;;  %v464_v16 = vadd.f32 %v399_v6, %v80_v2  ;;  %477 = vmatpush.msra.mxu0 %v430_v11 }
   0xf   :  { %v269_v47 = vld [vmem:[%s1439_s2 + $0x5d8] sm:$0xff]  ;;  %v392_v50 = vadd.f32 %v205_v46, %v141_v43  ;;  %546 = vmatpush.msra.mxu3 %v463_v48  ;;  %v427_v59 = vadd.f32 %v325_v49, %v43_v45  ;;  %v267_v10 = vld [vmem:[%s1439_s2 + $0x5c8] sm:$0xff]  ;;  %v388_v13 = vadd.f32 %v203_v9, %v139_v8  ;;  %v236_v19 = vld [vmem:[%s1439_s2 + $0x4d0] sm:$0xff]  ;;  %v326_v20 = vadd.f32 %v172_v15, %v108_v14 }
  0x10   :  { %524 = vmatpush.msra.mxu2 %v429_v38  ;;  %v77_v55 = vld [vmem:[%s1438_s1 + $0x1d8] sm:$0xff]  ;;  %v75_v18 = vld [vmem:[%s1438_s1 + $0x1c8] sm:$0xff]  ;;  %v142_v21 = vld [vmem:[%s1439_s2 + $0x1e0] sm:$0xff]  ;;  %499 = vmatpush.msra.mxu1 %v464_v16 }
  0x11   :  { %v393_v60 = vadd.f32 %v392_v50, %v269_v47  ;;  %v105_v0 = vld [vmem:[%s1439_s2 + $0xb8] sm:$0xff]  ;;  %v389_v22 = vadd.f32 %v388_v13, %v267_v10  ;;  %v44_v23 = vld [vmem:[%s1438_s1 + $0xd0] sm:$0xff]  ;;  %v206_v24 = vld [vmem:[%s1439_s2 + $0x3e0] sm:$0xff]  ;;  %v327_v27 = vadd.f32 %v326_v20, %v236_v19 }
  0x12   :  { %v169_v3 = vld [vmem:[%s1439_s2 + $0x2b8] sm:$0xff]  ;;  %525 = vmatpush.msra.mxu2 %v427_v59  ;;  %v270_v25 = vld [vmem:[%s1439_s2 + $0x5e0] sm:$0xff]  ;;  %v394_v28 = vadd.f32 %v206_v24, %v142_v21  ;;  %v103_v29 = vld [vmem:[%s1439_s2 + $0xa8] sm:$0xff] }
  0x13   :  { %v233_v4 = vld [vmem:[%s1439_s2 + $0x4b8] sm:$0xff]  ;;  %v461_v5 = vadd.f32 %v393_v60, %v77_v55  ;;  %v320_v7 = vadd.f32 %v169_v3, %v105_v0  ;;  %v167_v30 = vld [vmem:[%s1439_s2 + $0x2a8] sm:$0xff]  ;;  %v459_v32 = vadd.f32 %v389_v22, %v75_v18  ;;  %v78_v33 = vld [vmem:[%s1438_s1 + $0x1e0] sm:$0xff]  ;;  %v428_v37 = vadd.f32 %v327_v27, %v44_v23 }
  0x14   :  { %v41_v12 = vld [vmem:[%s1438_s1 + $0xb8] sm:$0xff]  ;;  %v231_v31 = vld [vmem:[%s1439_s2 + $0x4a8] sm:$0xff]  ;;  %v316_v34 = vadd.f32 %v167_v30, %v103_v29  ;;  %v395_v38 = vadd.f32 %v394_v28, %v270_v25  ;;  %v106_v42 = vld [vmem:[%s1439_s2 + $0xc0] sm:$0xff] }
  0x15   :  { %547 = vmatpush.msra.mxu3 %v461_v5  ;;  %v321_v17 = vadd.f32 %v320_v7, %v233_v4  ;;  %v137_v35 = vld [vmem:[%s1439_s2 + $0x1b8] sm:$0xff]  ;;  %v39_v39 = vld [vmem:[%s1438_s1 + $0xa8] sm:$0xff]  ;;  %v170_v45 = vld [vmem:[%s1439_s2 + $0x2c0] sm:$0xff]  ;;  %478 = vmatpush.msra.mxu0 %v428_v37 }
  0x16   :  { %v201_v36 = vld [vmem:[%s1439_s2 + $0x3b8] sm:$0xff]  ;;  %v317_v43 = vadd.f32 %v316_v34, %v231_v31  ;;  %v234_v46 = vld [vmem:[%s1439_s2 + $0x4c0] sm:$0xff]  ;;  %v462_v47 = vadd.f32 %v395_v38, %v78_v33  ;;  %v322_v49 = vadd.f32 %v170_v45, %v106_v42  ;;  %v140_v50 = vld [vmem:[%s1439_s2 + $0x1d0] sm:$0xff] }
  0x17   :  { %v425_v26 = vadd.f32 %v321_v17, %v41_v12  ;;  %v265_v40 = vld [vmem:[%s1439_s2 + $0x5b8] sm:$0xff]  ;;  %v384_v41 = vadd.f32 %v201_v36, %v137_v35  ;;  %548 = vmatpush.msra.mxu3 %v459_v32  ;;  %v204_v51 = vld [vmem:[%s1439_s2 + $0x3d0] sm:$0xff]  ;;  %v42_v54 = vld [vmem:[%s1438_s1 + $0xc0] sm:$0xff] }
  0x18   :  { %v73_v44 = vld [vmem:[%s1438_s1 + $0x1b8] sm:$0xff]  ;;  %v268_v52 = vld [vmem:[%s1439_s2 + $0x5d0] sm:$0xff]  ;;  %v423_v53 = vadd.f32 %v317_v43, %v39_v39  ;;  %v390_v55 = vadd.f32 %v204_v51, %v140_v50  ;;  %500 = vmatpush.msra.mxu1 %v462_v47  ;;  %v323_v59 = vadd.f32 %v322_v49, %v234_v46  ;;  %v135_v63 = vld [vmem:[%s1439_s2 + $0x1a8] sm:$0xff] }
  0x19   :  { %526 = vmatpush.msra.mxu2 %v425_v26  ;;  %v385_v48 = vadd.f32 %v384_v41, %v265_v40  ;;  %v101_v56 = vld [vmem:[%s1439_s2 + $0x98] sm:$0xff]  ;;  %v76_v60 = vld [vmem:[%s1438_s1 + $0x1d0] sm:$0xff]  ;;  %v199_v2 = vld [vmem:[%s1439_s2 + $0x3a8] sm:$0xff] }
  0x1a   :  { %v165_v57 = vld [vmem:[%s1439_s2 + $0x298] sm:$0xff]  ;;  %v391_v0 = vadd.f32 %v390_v55, %v268_v52  ;;  %v263_v3 = vld [vmem:[%s1439_s2 + $0x5a8] sm:$0xff]  ;;  %v426_v4 = vadd.f32 %v323_v59, %v42_v54  ;;  %v380_v6 = vadd.f32 %v199_v2, %v135_v63  ;;  %v104_v7 = vld [vmem:[%s1439_s2 + $0xb0] sm:$0xff] }
  0x1b   :  { %v457_v58 = vadd.f32 %v385_v48, %v73_v44  ;;  %v229_v61 = vld [vmem:[%s1439_s2 + $0x498] sm:$0xff]  ;;  %v312_v62 = vadd.f32 %v165_v57, %v101_v56  ;;  %527 = vmatpush.msra.mxu2 %v423_v53  ;;  %v168_v8 = vld [vmem:[%s1439_s2 + $0x2b0] sm:$0xff]  ;;  %v71_v11 = vld [vmem:[%s1438_s1 + $0x1a8] sm:$0xff] }
  0x1c   :  { %v37_v1 = vld [vmem:[%s1438_s1 + $0x98] sm:$0xff]  ;;  %v232_v9 = vld [vmem:[%s1439_s2 + $0x4b0] sm:$0xff]  ;;  %v460_v10 = vadd.f32 %v391_v0, %v76_v60  ;;  %v318_v12 = vadd.f32 %v168_v8, %v104_v7  ;;  %v138_v13 = vld [vmem:[%s1439_s2 + $0x1c0] sm:$0xff]  ;;  %479 = vmatpush.msra.mxu0 %v426_v4  ;;  %v381_v16 = vadd.f32 %v380_v6, %v263_v3 }
  0x1d   :  { %549 = vmatpush.msra.mxu3 %v457_v58  ;;  %v313_v5 = vadd.f32 %v312_v62, %v229_v61  ;;  %v202_v14 = vld [vmem:[%s1439_s2 + $0x3c0] sm:$0xff]  ;;  %v40_v17 = vld [vmem:[%s1438_s1 + $0xb0] sm:$0xff]  ;;  %v99_v20 = vld [vmem:[%s1439_s2 + $0x88] sm:$0xff] }
  0x1e   :  { %v266_v18 = vld [vmem:[%s1439_s2 + $0x5c0] sm:$0xff]  ;;  %v386_v19 = vadd.f32 %v202_v14, %v138_v13  ;;  %501 = vmatpush.msra.mxu1 %v460_v10  ;;  %v319_v21 = vadd.f32 %v318_v12, %v232_v9  ;;  %v163_v23 = vld [vmem:[%s1439_s2 + $0x288] sm:$0xff]  ;;  %v455_v25 = vadd.f32 %v381_v16, %v71_v11  ;;  %v133_v28 = vld [vmem:[%s1439_s2 + $0x198] sm:$0xff] }
  0x1f   :  { %v421_v15 = vadd.f32 %v313_v5, %v37_v1  ;;  %v74_v22 = vld [vmem:[%s1438_s1 + $0x1c0] sm:$0xff]  ;;  %v227_v24 = vld [vmem:[%s1439_s2 + $0x488] sm:$0xff]  ;;  %v308_v27 = vadd.f32 %v163_v23, %v99_v20  ;;  %v197_v29 = vld [vmem:[%s1439_s2 + $0x398] sm:$0xff] }
  0x20   :  { %v387_v26 = vadd.f32 %v386_v19, %v266_v18  ;;  %v261_v30 = vld [vmem:[%s1439_s2 + $0x598] sm:$0xff]  ;;  %v424_v31 = vadd.f32 %v319_v21, %v40_v17  ;;  %v35_v32 = vld [vmem:[%s1438_s1 + $0x88] sm:$0xff]  ;;  %v376_v33 = vadd.f32 %v197_v29, %v133_v28  ;;  %v102_v34 = vld [vmem:[%s1439_s2 + $0xa0] sm:$0xff]  ;;  %550 = vmatpush.msra.mxu3 %v455_v25 }
  0x21   :  { %528 = vmatpush.msra.mxu2 %v421_v15  ;;  %v166_v35 = vld [vmem:[%s1439_s2 + $0x2a0] sm:$0xff]  ;;  %v309_v37 = vadd.f32 %v308_v27, %v227_v24  ;;  %v69_v38 = vld [vmem:[%s1438_s1 + $0x198] sm:$0xff]  ;;  %v136_v41 = vld [vmem:[%s1439_s2 + $0x1b0] sm:$0xff] }
  0x22   :  { %v458_v36 = vadd.f32 %v387_v26, %v74_v22  ;;  %v230_v39 = vld [vmem:[%s1439_s2 + $0x4a0] sm:$0xff]  ;;  %v314_v40 = vadd.f32 %v166_v35, %v102_v34  ;;  %480 = vmatpush.msra.mxu0 %v424_v31  ;;  %v377_v42 = vadd.f32 %v376_v33, %v261_v30  ;;  %v200_v44 = vld [vmem:[%s1439_s2 + $0x3b0] sm:$0xff]  ;;  %v97_v49 = vld [vmem:[%s1439_s2 + $0x78] sm:$0xff] }
  0x23   :  { %v38_v43 = vld [vmem:[%s1438_s1 + $0xa0] sm:$0xff]  ;;  %v264_v45 = vld [vmem:[%s1439_s2 + $0x5b0] sm:$0xff]  ;;  %v419_v46 = vadd.f32 %v309_v37, %v35_v32  ;;  %v382_v48 = vadd.f32 %v200_v44, %v136_v41  ;;  %v161_v50 = vld [vmem:[%s1439_s2 + $0x278] sm:$0xff] }
  0x24   :  { %502 = vmatpush.msra.mxu1 %v458_v36  ;;  %v315_v47 = vadd.f32 %v314_v40, %v230_v39  ;;  %v225_v51 = vld [vmem:[%s1439_s2 + $0x478] sm:$0xff]  ;;  %v453_v52 = vadd.f32 %v377_v42, %v69_v38  ;;  %v72_v53 = vld [vmem:[%s1438_s1 + $0x1b0] sm:$0xff]  ;;  %v304_v54 = vadd.f32 %v161_v50, %v97_v49  ;;  %v131_v55 = vld [vmem:[%s1439_s2 + $0x188] sm:$0xff] }
  0x25   :  { %v195_v56 = vld [vmem:[%s1439_s2 + $0x388] sm:$0xff]  ;;  %529 = vmatpush.msra.mxu2 %v419_v46  ;;  %v383_v58 = vadd.f32 %v382_v48, %v264_v45  ;;  %v33_v59 = vld [vmem:[%s1438_s1 + $0x78] sm:$0xff]  ;;  %v100_v62 = vld [vmem:[%s1439_s2 + $0x90] sm:$0xff] }
  0x26   :  { %v422_v57 = vadd.f32 %v315_v47, %v38_v43  ;;  %v259_v60 = vld [vmem:[%s1439_s2 + $0x588] sm:$0xff]  ;;  %v372_v61 = vadd.f32 %v195_v56, %v131_v55  ;;  %551 = vmatpush.msra.mxu3 %v453_v52  ;;  %v305_v63 = vadd.f32 %v304_v54, %v225_v51  ;;  %v164_v1 = vld [vmem:[%s1439_s2 + $0x290] sm:$0xff]  ;;  %v134_v6 = vld [vmem:[%s1439_s2 + $0x1a0] sm:$0xff] }
  0x27   :  { %v67_v0 = vld [vmem:[%s1438_s1 + $0x188] sm:$0xff]  ;;  %v228_v2 = vld [vmem:[%s1439_s2 + $0x490] sm:$0xff]  ;;  %v456_v3 = vadd.f32 %v383_v58, %v72_v53  ;;  %v310_v5 = vadd.f32 %v164_v1, %v100_v62  ;;  %v198_v7 = vld [vmem:[%s1439_s2 + $0x3a0] sm:$0xff] }
  0x28   :  { %481 = vmatpush.msra.mxu0 %v422_v57  ;;  %v373_v4 = vadd.f32 %v372_v61, %v259_v60  ;;  %v262_v8 = vld [vmem:[%s1439_s2 + $0x5a0] sm:$0xff]  ;;  %v417_v9 = vadd.f32 %v305_v63, %v33_v59  ;;  %v36_v10 = vld [vmem:[%s1438_s1 + $0x90] sm:$0xff]  ;;  %v378_v11 = vadd.f32 %v198_v7, %v134_v6  ;;  %v95_v12 = vld [vmem:[%s1439_s2 + $0x68] sm:$0xff] }
  0x29   :  { %v159_v13 = vld [vmem:[%s1439_s2 + $0x268] sm:$0xff]  ;;  %503 = vmatpush.msra.mxu1 %v456_v3  ;;  %v311_v15 = vadd.f32 %v310_v5, %v228_v2  ;;  %v70_v16 = vld [vmem:[%s1438_s1 + $0x1a0] sm:$0xff]  ;;  %v129_v19 = vld [vmem:[%s1439_s2 + $0x178] sm:$0xff] }
  0x2a   :  { %v451_v14 = vadd.f32 %v373_v4, %v67_v0  ;;  %v223_v17 = vld [vmem:[%s1439_s2 + $0x468] sm:$0xff]  ;;  %v300_v18 = vadd.f32 %v159_v13, %v95_v12  ;;  %530 = vmatpush.msra.mxu2 %v417_v9  ;;  %v379_v20 = vadd.f32 %v378_v11, %v262_v8  ;;  %v193_v22 = vld [vmem:[%s1439_s2 + $0x378] sm:$0xff]  ;;  %v98_v27 = vld [vmem:[%s1439_s2 + $0x80] sm:$0xff] }
  0x2b   :  { %v31_v21 = vld [vmem:[%s1438_s1 + $0x68] sm:$0xff]  ;;  %v257_v23 = vld [vmem:[%s1439_s2 + $0x578] sm:$0xff]  ;;  %v420_v24 = vadd.f32 %v311_v15, %v36_v10  ;;  %v368_v26 = vadd.f32 %v193_v22, %v129_v19  ;;  %v162_v28 = vld [vmem:[%s1439_s2 + $0x280] sm:$0xff] }
  0x2c   :  { %552 = vmatpush.msra.mxu3 %v451_v14  ;;  %v301_v25 = vadd.f32 %v300_v18, %v223_v17  ;;  %v226_v29 = vld [vmem:[%s1439_s2 + $0x480] sm:$0xff]  ;;  %v454_v30 = vadd.f32 %v379_v20, %v70_v16  ;;  %v65_v31 = vld [vmem:[%s1438_s1 + $0x178] sm:$0xff]  ;;  %v306_v32 = vadd.f32 %v162_v28, %v98_v27  ;;  %v132_v33 = vld [vmem:[%s1439_s2 + $0x190] sm:$0xff] }
  0x2d   :  { %v196_v34 = vld [vmem:[%s1439_s2 + $0x390] sm:$0xff]  ;;  %482 = vmatpush.msra.mxu0 %v420_v24  ;;  %v369_v36 = vadd.f32 %v368_v26, %v257_v23  ;;  %v34_v37 = vld [vmem:[%s1438_s1 + $0x80] sm:$0xff]  ;;  %v93_v40 = vld [vmem:[%s1439_s2 + $0x58] sm:$0xff] }
  0x2e   :  { %v415_v35 = vadd.f32 %v301_v25, %v31_v21  ;;  %v260_v38 = vld [vmem:[%s1439_s2 + $0x590] sm:$0xff]  ;;  %v374_v39 = vadd.f32 %v196_v34, %v132_v33  ;;  %504 = vmatpush.msra.mxu1 %v454_v30  ;;  %v307_v41 = vadd.f32 %v306_v32, %v226_v29  ;;  %v157_v43 = vld [vmem:[%s1439_s2 + $0x258] sm:$0xff]  ;;  %v127_v48 = vld [vmem:[%s1439_s2 + $0x168] sm:$0xff] }
  0x2f   :  { %v68_v42 = vld [vmem:[%s1438_s1 + $0x190] sm:$0xff]  ;;  %v221_v44 = vld [vmem:[%s1439_s2 + $0x458] sm:$0xff]  ;;  %v449_v45 = vadd.f32 %v369_v36, %v65_v31  ;;  %v296_v47 = vadd.f32 %v157_v43, %v93_v40  ;;  %v191_v49 = vld [vmem:[%s1439_s2 + $0x368] sm:$0xff] }
  0x30   :  { %531 = vmatpush.msra.mxu2 %v415_v35  ;;  %v375_v46 = vadd.f32 %v374_v39, %v260_v38  ;;  %v255_v50 = vld [vmem:[%s1439_s2 + $0x568] sm:$0xff]  ;;  %v418_v51 = vadd.f32 %v307_v41, %v34_v37  ;;  %v29_v52 = vld [vmem:[%s1438_s1 + $0x58] sm:$0xff]  ;;  %v364_v53 = vadd.f32 %v191_v49, %v127_v48  ;;  %v96_v54 = vld [vmem:[%s1439_s2 + $0x70] sm:$0xff] }
  0x31   :  { %v160_v55 = vld [vmem:[%s1439_s2 + $0x270] sm:$0xff]  ;;  %553 = vmatpush.msra.mxu3 %v449_v45  ;;  %v297_v57 = vadd.f32 %v296_v47, %v221_v44  ;;  %v63_v58 = vld [vmem:[%s1438_s1 + $0x168] sm:$0xff]  ;;  %v130_v61 = vld [vmem:[%s1439_s2 + $0x180] sm:$0xff] }
  0x32   :  { %v452_v56 = vadd.f32 %v375_v46, %v68_v42  ;;  %v224_v59 = vld [vmem:[%s1439_s2 + $0x470] sm:$0xff]  ;;  %v302_v60 = vadd.f32 %v160_v55, %v96_v54  ;;  %483 = vmatpush.msra.mxu0 %v418_v51  ;;  %v365_v62 = vadd.f32 %v364_v53, %v255_v50  ;;  %v194_v0 = vld [vmem:[%s1439_s2 + $0x380] sm:$0xff]  ;;  %v91_v5 = vld [vmem:[%s1439_s2 + $0x48] sm:$0xff] }
  0x33   :  { %v32_v63 = vld [vmem:[%s1438_s1 + $0x70] sm:$0xff]  ;;  %v258_v1 = vld [vmem:[%s1439_s2 + $0x580] sm:$0xff]  ;;  %v413_v2 = vadd.f32 %v297_v57, %v29_v52  ;;  %v370_v4 = vadd.f32 %v194_v0, %v130_v61  ;;  %v155_v6 = vld [vmem:[%s1439_s2 + $0x248] sm:$0xff] }
  0x34   :  { %505 = vmatpush.msra.mxu1 %v452_v56  ;;  %v303_v3 = vadd.f32 %v302_v60, %v224_v59  ;;  %v219_v7 = vld [vmem:[%s1439_s2 + $0x448] sm:$0xff]  ;;  %v447_v8 = vadd.f32 %v365_v62, %v63_v58  ;;  %v66_v9 = vld [vmem:[%s1438_s1 + $0x180] sm:$0xff]  ;;  %v292_v10 = vadd.f32 %v155_v6, %v91_v5  ;;  %v125_v11 = vld [vmem:[%s1439_s2 + $0x158] sm:$0xff] }
  0x35   :  { %v189_v12 = vld [vmem:[%s1439_s2 + $0x358] sm:$0xff]  ;;  %532 = vmatpush.msra.mxu2 %v413_v2  ;;  %v371_v14 = vadd.f32 %v370_v4, %v258_v1  ;;  %v27_v15 = vld [vmem:[%s1438_s1 + $0x48] sm:$0xff]  ;;  %v94_v18 = vld [vmem:[%s1439_s2 + $0x60] sm:$0xff] }
  0x36   :  { %v416_v13 = vadd.f32 %v303_v3, %v32_v63  ;;  %v253_v16 = vld [vmem:[%s1439_s2 + $0x558] sm:$0xff]  ;;  %v360_v17 = vadd.f32 %v189_v12, %v125_v11  ;;  %554 = vmatpush.msra.mxu3 %v447_v8  ;;  %v293_v19 = vadd.f32 %v292_v10, %v219_v7  ;;  %v158_v21 = vld [vmem:[%s1439_s2 + $0x260] sm:$0xff]  ;;  %v128_v26 = vld [vmem:[%s1439_s2 + $0x170] sm:$0xff] }
  0x37   :  { %v61_v20 = vld [vmem:[%s1438_s1 + $0x158] sm:$0xff]  ;;  %v222_v22 = vld [vmem:[%s1439_s2 + $0x460] sm:$0xff]  ;;  %v450_v23 = vadd.f32 %v371_v14, %v66_v9  ;;  %v298_v25 = vadd.f32 %v158_v21, %v94_v18  ;;  %v192_v27 = vld [vmem:[%s1439_s2 + $0x370] sm:$0xff] }
  0x38   :  { %484 = vmatpush.msra.mxu0 %v416_v13  ;;  %v361_v24 = vadd.f32 %v360_v17, %v253_v16  ;;  %v256_v28 = vld [vmem:[%s1439_s2 + $0x570] sm:$0xff]  ;;  %v411_v29 = vadd.f32 %v293_v19, %v27_v15  ;;  %v30_v30 = vld [vmem:[%s1438_s1 + $0x60] sm:$0xff]  ;;  %v366_v31 = vadd.f32 %v192_v27, %v128_v26  ;;  %v89_v32 = vld [vmem:[%s1439_s2 + $0x38] sm:$0xff] }
  0x39   :  { %v153_v33 = vld [vmem:[%s1439_s2 + $0x238] sm:$0xff]  ;;  %506 = vmatpush.msra.mxu1 %v450_v23  ;;  %v299_v35 = vadd.f32 %v298_v25, %v222_v22  ;;  %v64_v36 = vld [vmem:[%s1438_s1 + $0x170] sm:$0xff]  ;;  %v123_v39 = vld [vmem:[%s1439_s2 + $0x148] sm:$0xff] }
  0x3a   :  { %v445_v34 = vadd.f32 %v361_v24, %v61_v20  ;;  %v217_v37 = vld [vmem:[%s1439_s2 + $0x438] sm:$0xff]  ;;  %v288_v38 = vadd.f32 %v153_v33, %v89_v32  ;;  %533 = vmatpush.msra.mxu2 %v411_v29  ;;  %v367_v40 = vadd.f32 %v366_v31, %v256_v28  ;;  %v187_v42 = vld [vmem:[%s1439_s2 + $0x348] sm:$0xff]  ;;  %v92_v47 = vld [vmem:[%s1439_s2 + $0x50] sm:$0xff] }
  0x3b   :  { %v25_v41 = vld [vmem:[%s1438_s1 + $0x38] sm:$0xff]  ;;  %v251_v43 = vld [vmem:[%s1439_s2 + $0x548] sm:$0xff]  ;;  %v414_v44 = vadd.f32 %v299_v35, %v30_v30  ;;  %v356_v46 = vadd.f32 %v187_v42, %v123_v39  ;;  %v156_v48 = vld [vmem:[%s1439_s2 + $0x250] sm:$0xff] }
  0x3c   :  { %555 = vmatpush.msra.mxu3 %v445_v34  ;;  %v289_v45 = vadd.f32 %v288_v38, %v217_v37  ;;  %v220_v49 = vld [vmem:[%s1439_s2 + $0x450] sm:$0xff]  ;;  %v448_v50 = vadd.f32 %v367_v40, %v64_v36  ;;  %v59_v51 = vld [vmem:[%s1438_s1 + $0x148] sm:$0xff]  ;;  %v294_v52 = vadd.f32 %v156_v48, %v92_v47  ;;  %v126_v53 = vld [vmem:[%s1439_s2 + $0x160] sm:$0xff] }
  0x3d   :  { %v190_v54 = vld [vmem:[%s1439_s2 + $0x360] sm:$0xff]  ;;  %485 = vmatpush.msra.mxu0 %v414_v44  ;;  %v357_v56 = vadd.f32 %v356_v46, %v251_v43  ;;  %v28_v57 = vld [vmem:[%s1438_s1 + $0x50] sm:$0xff]  ;;  %v87_v60 = vld [vmem:[%s1439_s2 + $0x28] sm:$0xff] }
  0x3e   :  { %v409_v55 = vadd.f32 %v289_v45, %v25_v41  ;;  %v254_v58 = vld [vmem:[%s1439_s2 + $0x560] sm:$0xff]  ;;  %v362_v59 = vadd.f32 %v190_v54, %v126_v53  ;;  %507 = vmatpush.msra.mxu1 %v448_v50  ;;  %v295_v61 = vadd.f32 %v294_v52, %v220_v49  ;;  %v151_v63 = vld [vmem:[%s1439_s2 + $0x228] sm:$0xff]  ;;  %v121_v4 = vld [vmem:[%s1439_s2 + $0x138] sm:$0xff] }
  0x3f   :  { %v62_v62 = vld [vmem:[%s1438_s1 + $0x160] sm:$0xff]  ;;  %v215_v0 = vld [vmem:[%s1439_s2 + $0x428] sm:$0xff]  ;;  %v443_v1 = vadd.f32 %v357_v56, %v59_v51  ;;  %v284_v3 = vadd.f32 %v151_v63, %v87_v60  ;;  %v185_v5 = vld [vmem:[%s1439_s2 + $0x338] sm:$0xff] }
  0x40   :  { %534 = vmatpush.msra.mxu2 %v409_v55  ;;  %v363_v2 = vadd.f32 %v362_v59, %v254_v58  ;;  %v249_v6 = vld [vmem:[%s1439_s2 + $0x538] sm:$0xff]  ;;  %v412_v7 = vadd.f32 %v295_v61, %v28_v57  ;;  %v23_v8 = vld [vmem:[%s1438_s1 + $0x28] sm:$0xff]  ;;  %v352_v9 = vadd.f32 %v185_v5, %v121_v4  ;;  %v90_v10 = vld [vmem:[%s1439_s2 + $0x40] sm:$0xff] }
  0x41   :  { %v154_v11 = vld [vmem:[%s1439_s2 + $0x240] sm:$0xff]  ;;  %556 = vmatpush.msra.mxu3 %v443_v1  ;;  %v285_v13 = vadd.f32 %v284_v3, %v215_v0  ;;  %v57_v14 = vld [vmem:[%s1438_s1 + $0x138] sm:$0xff]  ;;  %v124_v17 = vld [vmem:[%s1439_s2 + $0x150] sm:$0xff] }
  0x42   :  { %v446_v12 = vadd.f32 %v363_v2, %v62_v62  ;;  %v218_v15 = vld [vmem:[%s1439_s2 + $0x440] sm:$0xff]  ;;  %v290_v16 = vadd.f32 %v154_v11, %v90_v10  ;;  %486 = vmatpush.msra.mxu0 %v412_v7  ;;  %v353_v18 = vadd.f32 %v352_v9, %v249_v6  ;;  %v188_v20 = vld [vmem:[%s1439_s2 + $0x350] sm:$0xff]  ;;  %v85_v25 = vld [vmem:[%s1439_s2 + $0x18] sm:$0xff] }
  0x43   :  { %v26_v19 = vld [vmem:[%s1438_s1 + $0x40] sm:$0xff]  ;;  %v252_v21 = vld [vmem:[%s1439_s2 + $0x550] sm:$0xff]  ;;  %v407_v22 = vadd.f32 %v285_v13, %v23_v8  ;;  %v358_v24 = vadd.f32 %v188_v20, %v124_v17  ;;  %v149_v26 = vld [vmem:[%s1439_s2 + $0x218] sm:$0xff] }
  0x44   :  { %508 = vmatpush.msra.mxu1 %v446_v12  ;;  %v291_v23 = vadd.f32 %v290_v16, %v218_v15  ;;  %v213_v27 = vld [vmem:[%s1439_s2 + $0x418] sm:$0xff]  ;;  %v441_v28 = vadd.f32 %v353_v18, %v57_v14  ;;  %v60_v29 = vld [vmem:[%s1438_s1 + $0x150] sm:$0xff]  ;;  %v280_v30 = vadd.f32 %v149_v26, %v85_v25  ;;  %v119_v31 = vld [vmem:[%s1439_s2 + $0x128] sm:$0xff] }
  0x45   :  { %v183_v32 = vld [vmem:[%s1439_s2 + $0x328] sm:$0xff]  ;;  %535 = vmatpush.msra.mxu2 %v407_v22  ;;  %v359_v34 = vadd.f32 %v358_v24, %v252_v21  ;;  %v21_v35 = vld [vmem:[%s1438_s1 + $0x18] sm:$0xff]  ;;  %v88_v38 = vld [vmem:[%s1439_s2 + $0x30] sm:$0xff] }
  0x46   :  { %v410_v33 = vadd.f32 %v291_v23, %v26_v19  ;;  %v247_v36 = vld [vmem:[%s1439_s2 + $0x528] sm:$0xff]  ;;  %v348_v37 = vadd.f32 %v183_v32, %v119_v31  ;;  %557 = vmatpush.msra.mxu3 %v441_v28  ;;  %v281_v39 = vadd.f32 %v280_v30, %v213_v27  ;;  %v152_v41 = vld [vmem:[%s1439_s2 + $0x230] sm:$0xff]  ;;  %v122_v46 = vld [vmem:[%s1439_s2 + $0x140] sm:$0xff] }
  0x47   :  { %v55_v40 = vld [vmem:[%s1438_s1 + $0x128] sm:$0xff]  ;;  %v216_v42 = vld [vmem:[%s1439_s2 + $0x430] sm:$0xff]  ;;  %v444_v43 = vadd.f32 %v359_v34, %v60_v29  ;;  %v286_v45 = vadd.f32 %v152_v41, %v88_v38  ;;  %v186_v47 = vld [vmem:[%s1439_s2 + $0x340] sm:$0xff] }
  0x48   :  { %487 = vmatpush.msra.mxu0 %v410_v33  ;;  %v349_v44 = vadd.f32 %v348_v37, %v247_v36  ;;  %v250_v48 = vld [vmem:[%s1439_s2 + $0x540] sm:$0xff]  ;;  %v405_v49 = vadd.f32 %v281_v39, %v21_v35  ;;  %v24_v50 = vld [vmem:[%s1438_s1 + $0x30] sm:$0xff]  ;;  %v354_v51 = vadd.f32 %v186_v47, %v122_v46  ;;  %v83_v52 = vld [vmem:[%s1439_s2 + $0x8] sm:$0xff] }
  0x49   :  { %v147_v53 = vld [vmem:[%s1439_s2 + $0x208] sm:$0xff]  ;;  %509 = vmatpush.msra.mxu1 %v444_v43  ;;  %v287_v55 = vadd.f32 %v286_v45, %v216_v42  ;;  %v58_v56 = vld [vmem:[%s1438_s1 + $0x140] sm:$0xff]  ;;  %v117_v59 = vld [vmem:[%s1439_s2 + $0x118] sm:$0xff] }
  0x4a   :  { %v439_v54 = vadd.f32 %v349_v44, %v55_v40  ;;  %v211_v57 = vld [vmem:[%s1439_s2 + $0x408] sm:$0xff]  ;;  %v276_v58 = vadd.f32 %v147_v53, %v83_v52  ;;  %536 = vmatpush.msra.mxu2 %v405_v49  ;;  %v355_v60 = vadd.f32 %v354_v51, %v250_v48  ;;  %v181_v62 = vld [vmem:[%s1439_s2 + $0x318] sm:$0xff]  ;;  %v86_v4 = vld [vmem:[%s1439_s2 + $0x20] sm:$0xff] }
  0x4b   :  { %v19_v61 = vld [vmem:[%s1438_s1 + $0x8] sm:$0xff]  ;;  %v245_v63 = vld [vmem:[%s1439_s2 + $0x518] sm:$0xff]  ;;  %v408_v0 = vadd.f32 %v287_v55, %v24_v50  ;;  %v344_v3 = vadd.f32 %v181_v62, %v117_v59  ;;  %v150_v5 = vld [vmem:[%s1439_s2 + $0x220] sm:$0xff] }
  0x4c   :  { %558 = vmatpush.msra.mxu3 %v439_v54  ;;  %v277_v1 = vadd.f32 %v276_v58, %v211_v57  ;;  %v53_v2 = vld [vmem:[%s1438_s1 + $0x118] sm:$0xff]  ;;  %v442_v6 = vadd.f32 %v355_v60, %v58_v56  ;;  %v1328_v7 = vld [vmem:[%s1437_s0] sm:$0xff]  ;;  %v282_v9 = vadd.f32 %v150_v5, %v86_v4  ;;  %v120_v10 = vld [vmem:[%s1439_s2 + $0x130] sm:$0xff] }
  0x4d   :  { %v214_v8 = vld [vmem:[%s1439_s2 + $0x420] sm:$0xff]  ;;  %488 = vmatpush.msra.mxu0 %v408_v0  ;;  %v345_v12 = vadd.f32 %v344_v3, %v245_v63  ;;  %v184_v14 = vld [vmem:[%s1439_s2 + $0x330] sm:$0xff]  ;;  %v115_v18 = vld [vmem:[%s1439_s2 + $0x108] sm:$0xff] }
  0x4e   :  { %v403_v11 = vadd.f32 %v277_v1, %v19_v61  ;;  %v22_v13 = vld [vmem:[%s1438_s1 + $0x20] sm:$0xff]  ;;  %v248_v15 = vld [vmem:[%s1439_s2 + $0x530] sm:$0xff]  ;;  %510 = vmatpush.msra.mxu1 %v442_v6  ;;  %v283_v16 = vadd.f32 %v282_v9, %v214_v8  ;;  %v350_v17 = vadd.f32 %v184_v14, %v120_v10  ;;  %v179_v19 = vld [vmem:[%s1439_s2 + $0x308] sm:$0xff] }
  0x4f   :  { %v243_v20 = vld [vmem:[%s1439_s2 + $0x508] sm:$0xff]  ;;  %v437_v21 = vadd.f32 %v345_v12, %v53_v2  ;;  %v56_v22 = vld [vmem:[%s1438_s1 + $0x130] sm:$0xff]  ;;  %v340_v23 = vadd.f32 %v179_v19, %v115_v18  ;;  %v118_v33 = vld [vmem:[%s1439_s2 + $0x120] sm:$0xff] }
  0x50   :  { %537 = vmatpush.msra.mxu2 %v403_v11  ;;  %v84_v24 = vld [vmem:[%s1439_s2 + $0x10] sm:$0xff]  ;;  %v406_v25 = vadd.f32 %v283_v16, %v22_v13  ;;  %v351_v26 = vadd.f32 %v350_v17, %v248_v15  ;;  %v51_v27 = vld [vmem:[%s1438_s1 + $0x108] sm:$0xff]  ;;  %v182_v34 = vld [vmem:[%s1439_s2 + $0x320] sm:$0xff] }
  0x51   :  { %538 = vmatmul.f32.vlgmr.msra.gmra.mxu2 %v1328_v7  ;;  %v148_v28 = vld [vmem:[%s1439_s2 + $0x210] sm:$0xff]  ;;  %559 = vmatpush.msra.mxu3 %v437_v21  ;;  %v341_v30 = vadd.f32 %v340_v23, %v243_v20  ;;  %v467_v31 = vld [vmem:[%s1437_s0 + $0x8] sm:$0xff]  ;;  %v246_v35 = vld [vmem:[%s1439_s2 + $0x520] sm:$0xff]  ;;  %v346_v38 = vadd.f32 %v182_v34, %v118_v33 }
  0x52   :  { %v212_v29 = vld [vmem:[%s1439_s2 + $0x410] sm:$0xff]  ;;  %v278_v32 = vadd.f32 %v148_v28, %v84_v24  ;;  %489 = vmatpush.msra.mxu0 %v406_v25  ;;  %v440_v36 = vadd.f32 %v351_v26, %v56_v22  ;;  %v82_v39 = vld [vmem:[%s1439_s2] sm:$0xff] }
  0x53   :  { %v20_v37 = vld [vmem:[%s1438_s1 + $0x10] sm:$0xff]  ;;  %v146_v40 = vld [vmem:[%s1439_s2 + $0x200] sm:$0xff]  ;;  %v435_v41 = vadd.f32 %v341_v30, %v51_v27  ;;  %v347_v47 = vadd.f32 %v346_v38, %v246_v35 }
  0x54   :  { %v279_v42 = vadd.f32 %v278_v32, %v212_v29  ;;  %v54_v43 = vld [vmem:[%s1438_s1 + $0x120] sm:$0xff]  ;;  %v274_v45 = vadd.f32 %v146_v40, %v82_v39  ;;  %v116_v46 = vld [vmem:[%s1439_s2 + $0x110] sm:$0xff]  ;;  %511 = vmatpush.msra.mxu1 %v440_v36 }
  0x55   :  { %v210_v44 = vld [vmem:[%s1439_s2 + $0x400] sm:$0xff]  ;;  %v180_v49 = vld [vmem:[%s1439_s2 + $0x310] sm:$0xff]  ;;  %560 = vmatpush.msra.mxu3 %v435_v41  ;;  %v438_v57 = vadd.f32 %v347_v47, %v54_v43 }
  0x56   :  { %v18_v48 = vld [vmem:[%s1438_s1] sm:$0xff]  ;;  %v244_v50 = vld [vmem:[%s1439_s2 + $0x510] sm:$0xff]  ;;  %v404_v51 = vadd.f32 %v279_v42, %v20_v37  ;;  %v275_v52 = vadd.f32 %v274_v45, %v210_v44  ;;  %v342_v53 = vadd.f32 %v180_v49, %v116_v46  ;;  %561 = vmatmul.f32.vlgmr.msra.gmra.mxu3 %v467_v31 }
  0x57   :  { %v114_v54 = vld [vmem:[%s1439_s2 + $0x100] sm:$0xff]  ;;  %v52_v58 = vld [vmem:[%s1438_s1 + $0x110] sm:$0xff] }
  0x58   :  { %v178_v55 = vld [vmem:[%s1439_s2 + $0x300] sm:$0xff]  ;;  %v468_v60 = vld [vmem:[%s1437_s0 + $0x10] sm:$0xff]  ;;  %490 = vmatpush.msra.mxu0 %v404_v51  ;;  %v402_v61 = vadd.f32 %v275_v52, %v18_v48  ;;  %v343_v62 = vadd.f32 %v342_v53, %v244_v50 }
  0x59   :  { %v242_v56 = vld [vmem:[%s1439_s2 + $0x500] sm:$0xff]  ;;  %v338_v59 = vadd.f32 %v178_v55, %v114_v54 }
  0x5a   :  { %v50_v63 = vld [vmem:[%s1438_s1 + $0x100] sm:$0xff] }
  0x5b   :  { %9 = vsyncpa [#allocation3], 0  ;;  %512 = vmatpush.msra.mxu1 %v438_v57  ;;  %v339_v0 = vadd.f32 %v338_v59, %v242_v56  ;;  %541 = vmatmul.f32.gmra.mxu2 %v468_v60  ;;  %v436_v1 = vadd.f32 %v343_v62, %v52_v58  ;;  %v469_v3 = vld [vmem:[%s1437_s0 + $0x18] sm:$0xff]  ;;  %v470_v4 = vld [vmem:[%s1440_s3] sm:$0x3]  ;;  %s619_s0 = smov [#allocation2]  }
  0x5c   :  { %491 = vmatpush.msra.mxu0 %v402_v61  ;;  %v473_v5 = vperm.slane %v470_v4, 1  ;;  %v472_v8 = vperm.slane %v470_v4, 0  ;;  %s576_s15 = sshll.u32 %s619_s0, 4  ;;  %s578_s17 = sshll.u32 %s1441_s4, 4  ;;  %s577_s15 = int_to_ptr.vmem [resolvable:$true] %s576_s15  ;;  %s579_s17 = int_to_ptr.hbm [resolvable:$true] %s578_s17 }
  0x5d   :  { %492 = vmatmul.f32.vlgmr.msra.gmra.mxu0 %v1328_v7  ;;  %v434_v2 = vadd.f32 %v339_v0, %v50_v63  ;;  %513 = vmatpush.msra.mxu1 %v436_v1  ;;  %s620_s18 = smov 256   ;;  %s621_s19 = smov 16  }
  0x5e   :  { %564 = vmatmul.f32.gmra.mxu3 %v469_v3 }
  0x5f   :  { %514 = vmatpush.msra.mxu1 %v434_v2 }
  0x60   :  { %515 = vmatmul.f32.vlgmr.msra.gmra.mxu1 %v467_v31 }
  0x65   :  { %495 = vmatmul.f32.gmra.mxu0 %v468_v60 }
  0x68   :  { %518 = vmatmul.f32.gmra.mxu1 %v469_v3 }
  0xd4   :  { %v539_v6 = vpop.f32.mrf.mxu2 }
  0xd5   :  { %v540_v9 = vadd.f32 %v539_v6, %v473_v5 }
  0xd9   :  { %v562_v11 = vpop.f32.mrf.mxu3 }
  0xda   :  { %v493_v7 = vpop.f32.mrf.mxu0  ;;  %v563_v12 = vadd.f32 %v562_v11, %v540_v9 }
  0xdb   :  { %v494_v10 = vadd.f32 %v493_v7, %v472_v8 }
  0xdc   :  { %569 = vst [vmem:[#allocation2 + $0x8] sm:$0xff] %v563_v12 }
  0xdd   :  { %v516_v13 = vpop.f32.mrf.mxu1 }
  0xde   :  { %v542_v14 = vpop.f32.mrf.mxu2  ;;  %v517_v15 = vadd.f32 %v516_v13, %v494_v10 }
  0xdf   :  { %v543_v16 = vadd.f32 %v542_v14, %v473_v5 }
  0xe0   :  { %568 = vst [vmem:[#allocation2] sm:$0xff] %v517_v15 }
  0xe1   :  { %v565_v19 = vpop.f32.mrf.mxu3 }
  0xe2   :  { %v496_v17 = vpop.f32.mrf.mxu0  ;;  %v566_v20 = vadd.f32 %v565_v19, %v543_v16 }
  0xe3   :  { %v497_v18 = vadd.f32 %v496_v17, %v472_v8 }
  0xe4   :  { %571 = vst [vmem:[#allocation2 + $0x18] sm:$0xff] %v566_v20 }
  0xe5   :  { %v519_v21 = vpop.f32.mrf.mxu1 }
  0xe6   :  { %v520_v22 = vadd.f32 %v519_v21, %v497_v18 }
  0xe8   :  { %570 = vst [vmem:[#allocation2 + $0x10] sm:$0xff] %v520_v22 }
  0xe9   :  { %584 = dma.vmem_to_hbm [thread:$0]  %s577_s15, 512, %s579_s17, [#allocation3], %s620_s18, %s620_s18, %s621_s19  }
  0xea   :  { %617 = dma.done.wait [#allocation3], 512  }
  0xeb   :  { %618 = vsyncadd [#allocation3], 4294966784 }
  0xec   :  { %589 = vsyncpa [#allocation3], 1 }

</bundles_post_ra>
